<compile_context>
chip_gen: v7x
topology: tpu7x:2x2x1
jax: 0.10.0
libtpu: 0.0.40
codegen_flags: <defaults>
</compile_context>

<pallas_src>
import numpy as np
import jax
import jax.numpy as jnp
from jax.experimental import pallas as pl
from jax.experimental.pallas import tpu as pltpu

EMB = 64            # embedding_size
HID = 32            # rnn_embedding_size
LANE = 128          # TPU lane width
MAX_TILE_B = 1024   # ~85%+ of HBM roofline for mem-bound streaming kernels


def _round_up(x, m):
    return (x + m - 1) // m * m


def _sigmoid(x):
    # EUP tanh-based sigmoid == 1/(1+exp(-x)) (avoids the VALU divide).
    return 0.5 * (jnp.tanh(0.5 * x) + 1.0)


def _gru_qnet_kernel(x_ref, h_ref,
                     w_emb_ref, b_emb_ref,
                     w_ir_ref, w_iz_ref, w_in_ref,
                     w_hr_ref, w_hz_ref, w_hn_ref,
                     b_r_ref, b_z_ref, b_in_ref, b_hn_ref,
                     w_pack_ref, b_pack_ref,
                     out_ref):
    x = x_ref[...]                                         # (TILE_B, d_in)
    h = h_ref[...]                                         # (TILE_B, 32)

    # embedding_net: Linear(input_size, 64) + ReLU
    emb = jnp.maximum(
        jnp.dot(x, w_emb_ref[...], preferred_element_type=jnp.float32)
        + b_emb_ref[...], 0.0)                             # (TILE_B, 64)

    # GRUCell — one lane-offset-0 matmul per gate (no sub-128-lane slicing of
    # a stacked 96-lane gate block, hence no cross-lane relayout work).
    r = _sigmoid(
        jnp.dot(emb, w_ir_ref[...], preferred_element_type=jnp.float32)
        + jnp.dot(h, w_hr_ref[...], preferred_element_type=jnp.float32)
        + b_r_ref[...])
    z = _sigmoid(
        jnp.dot(emb, w_iz_ref[...], preferred_element_type=jnp.float32)
        + jnp.dot(h, w_hz_ref[...], preferred_element_type=jnp.float32)
        + b_z_ref[...])
    n = jnp.tanh(
        jnp.dot(emb, w_in_ref[...], preferred_element_type=jnp.float32)
        + b_in_ref[...]
        + r * (jnp.dot(h, w_hn_ref[...], preferred_element_type=jnp.float32)
               + b_hn_ref[...]))
    h_new = (1.0 - z) * n + z * h                          # (TILE_B, 32)

    # Single lane-dense output slab: w_pack = [ w_q | I_32 | 0-pad ], so
    # q lands in lanes [0, n_out) and h_new in lanes [n_out, n_out+32).
    out_ref[...] = (jnp.dot(h_new, w_pack_ref[...],
                            preferred_element_type=jnp.float32)
                    + b_pack_ref[...])


def gru_qnet_forward(x, h, params):
    """Functional forward: returns (q_values (B, output_size), new_hidden (B, 32))."""
    B, d_in = x.shape
    n_out = params["w_q"].shape[1]

    # Batch tiling (no wrapper-side padding of x / h):
    #  * small B: one block spanning the full batch dim (always layout-legal).
    #  * large B: sublane-aligned tiles, >= 2 grid steps so v7x's two
    #    TensorCores can both work the "parallel" axis; ragged last block is
    #    masked by Pallas on the write side.
    if B <= 256:
        TILE_B = B
    else:
        TILE_B = min(MAX_TILE_B, _round_up(pl.cdiv(B, 2), 8))
    grid = (pl.cdiv(B, TILE_B),)

    # Per-gate weight split (gate order r | z | n) + bias folding.
    w_ih, w_hh = params["w_ih"], params["w_hh"]
    b_ih, b_hh = params["b_ih"], params["b_hh"]
    w_ir, w_iz, w_in_g = w_ih[:, :HID], w_ih[:, HID:2 * HID], w_ih[:, 2 * HID:]
    w_hr, w_hz, w_hn = w_hh[:, :HID], w_hh[:, HID:2 * HID], w_hh[:, 2 * HID:]
    b_r = b_ih[:, :HID] + b_hh[:, :HID]
    b_z = b_ih[:, HID:2 * HID] + b_hh[:, HID:2 * HID]
    b_in_g = b_ih[:, 2 * HID:]
    b_hn = b_hh[:, 2 * HID:]                  # stays separate: n uses r*(Wh h + b_hn)

    # Packed, lane-dense output weights: q columns then identity columns for h_new.
    w_total = _round_up(n_out + HID, LANE)
    w_pack = jnp.zeros((HID, w_total), jnp.float32)
    w_pack = w_pack.at[:, :n_out].set(params["w_q"])
    w_pack = w_pack.at[:, n_out:n_out + HID].set(jnp.eye(HID, dtype=jnp.float32))
    b_pack = jnp.zeros((1, w_total), jnp.float32).at[:, :n_out].set(params["b_q"])

    def batch_spec(d):
        return pl.BlockSpec((TILE_B, d), lambda i: (i, 0))

    def w_spec(r, c):
        return pl.BlockSpec((r, c), lambda i: (0, 0))       # resident weights

    out = pl.pallas_call(
        _gru_qnet_kernel,
        out_shape=jax.ShapeDtypeStruct((B, w_total), jnp.float32),
        grid=grid,
        in_specs=[
            batch_spec(d_in),                 # x tile
            batch_spec(HID),                  # hidden tile
            w_spec(d_in, EMB),                # embedding_net.weight^T
            w_spec(1, EMB),                   # embedding_net.bias
            w_spec(EMB, HID),                 # W_ir^T
            w_spec(EMB, HID),                 # W_iz^T
            w_spec(EMB, HID),                 # W_in^T
            w_spec(HID, HID),                 # W_hr^T
            w_spec(HID, HID),                 # W_hz^T
            w_spec(HID, HID),                 # W_hn^T
            w_spec(1, HID),                   # b_r (= b_ir + b_hr)
            w_spec(1, HID),                   # b_z (= b_iz + b_hz)
            w_spec(1, HID),                   # b_in
            w_spec(1, HID),                   # b_hn
            w_spec(HID, w_total),             # packed q_net weight + identity
            w_spec(1, w_total),               # packed q_net bias
        ],
        out_specs=pl.BlockSpec((TILE_B, w_total), lambda i: (i, 0)),
        compiler_params=pltpu.CompilerParams(
            dimension_semantics=("parallel",)),
    )(x, h, params["w_emb"], params["b_emb"],
      w_ir, w_iz, w_in_g, w_hr, w_hz, w_hn,
      b_r, b_z, b_in_g, b_hn, w_pack, b_pack)

    q = out[:, :n_out]
    h_new = out[:, n_out:n_out + HID]
    return q, h_new


def reference_forward(x, h, params):
    """Pure-JAX mirror of the PyTorch forward (for validation)."""
    emb = jax.nn.relu(x @ params["w_emb"] + params["b_emb"])
    gi = emb @ params["w_ih"] + params["b_ih"]
    gh = h @ params["w_hh"] + params["b_hh"]
    r = jax.nn.sigmoid(gi[:, :HID] + gh[:, :HID])
    z = jax.nn.sigmoid(gi[:, HID:2 * HID] + gh[:, HID:2 * HID])
    n = jnp.tanh(gi[:, 2 * HID:] + r * gh[:, 2 * HID:])
    h_new = (1.0 - z) * n + z * h
    q = h_new @ params["w_q"] + params["b_q"]
    return q, h_new


def init_params(key, d_in, n_out):
    """Deterministic synthetic parameters (PyTorch-style uniform init scales)."""
    ks = jax.random.split(key, 10)

    def uni(k, shape, bound):
        return jax.random.uniform(k, shape, jnp.float32, -bound, bound)

    return {
        # embedding_net: Linear(d_in, 64)
        "w_emb": uni(ks[0], (d_in, EMB), 1.0 / np.sqrt(d_in)),
        "b_emb": uni(ks[1], (1, EMB), 1.0 / np.sqrt(d_in)),
        # GRUCell(64, 32): weights transposed, gate order r|z|n
        "w_ih": uni(ks[2], (EMB, 3 * HID), 1.0 / np.sqrt(HID)),
        "b_ih": uni(ks[3], (1, 3 * HID), 1.0 / np.sqrt(HID)),
        "w_hh": uni(ks[4], (HID, 3 * HID), 1.0 / np.sqrt(HID)),
        "b_hh": uni(ks[5], (1, 3 * HID), 1.0 / np.sqrt(HID)),
        # q_net: Linear(32, n_out)
        "w_q": uni(ks[6], (HID, n_out), 1.0 / np.sqrt(HID)),
        "b_q": uni(ks[7], (1, n_out), 1.0 / np.sqrt(HID)),
    }


if __name__ == "__main__":
    B, INPUT_SIZE, OUTPUT_SIZE = 2, 16, 6

    key = jax.random.PRNGKey(0)
    k_params, k_x, k_h = jax.random.split(key, 3)

    params = init_params(k_params, INPUT_SIZE, OUTPUT_SIZE)
    x = jax.random.normal(k_x, (B, INPUT_SIZE), jnp.float32)
    # self.init_hidden(batch_size=B): torch.randn -> deterministic jax.random here.
    hidden = jax.random.normal(k_h, (B, HID), jnp.float32)

    q_val, h_new = gru_qnet_forward(x, hidden, params)
    q_val = jax.block_until_ready(q_val)
    h_new = jax.block_until_ready(h_new)

    q_ref, h_ref = reference_forward(x, hidden, params)
    np.testing.assert_allclose(np.asarray(q_val), np.asarray(q_ref),
                               rtol=1e-4, atol=1e-4)
    np.testing.assert_allclose(np.asarray(h_new), np.asarray(h_ref),
                               rtol=1e-4, atol=1e-4)
    assert q_val.shape == (B, OUTPUT_SIZE)
    assert h_new.shape == (B, HID)

    print("KERNEL_OK")
</pallas_src>

<mosaic_0001>
module attributes {stable_mosaic.version = 11 : i64} {
  func.func @_gru_qnet_kernel(%arg0: i32, %arg1: memref<2x16xf32, #tpu.memory_space<vmem>>, %arg2: memref<2x32xf32, #tpu.memory_space<vmem>>, %arg3: memref<16x64xf32, #tpu.memory_space<vmem>>, %arg4: memref<1x64xf32, #tpu.memory_space<vmem>>, %arg5: memref<64x32xf32, #tpu.memory_space<vmem>>, %arg6: memref<64x32xf32, #tpu.memory_space<vmem>>, %arg7: memref<64x32xf32, #tpu.memory_space<vmem>>, %arg8: memref<32x32xf32, #tpu.memory_space<vmem>>, %arg9: memref<32x32xf32, #tpu.memory_space<vmem>>, %arg10: memref<32x32xf32, #tpu.memory_space<vmem>>, %arg11: memref<1x32xf32, #tpu.memory_space<vmem>>, %arg12: memref<1x32xf32, #tpu.memory_space<vmem>>, %arg13: memref<1x32xf32, #tpu.memory_space<vmem>>, %arg14: memref<1x32xf32, #tpu.memory_space<vmem>>, %arg15: memref<32x128xf32, #tpu.memory_space<vmem>>, %arg16: memref<1x128xf32, #tpu.memory_space<vmem>>, %arg17: memref<2x128xf32, #tpu.memory_space<vmem>>) attributes {dimension_semantics = [#tpu.dimension_semantics<parallel>], iteration_bounds = array<i64: 1>, scalar_prefetch = 0 : i64, scratch_operands = 0 : i64, tpu.core_type = #tpu.core_type<tc>, window_params = [{transform_indices = @transform_0, window_bounds = array<i64: 2, 16>}, {transform_indices = @transform_1, window_bounds = array<i64: 2, 32>}, {pipeline_mode = #tpu.pipeline_mode<synchronous>, transform_indices = @transform_2, window_bounds = array<i64: 16, 64>}, {pipeline_mode = #tpu.pipeline_mode<synchronous>, transform_indices = @transform_3, window_bounds = array<i64: 1, 64>}, {pipeline_mode = #tpu.pipeline_mode<synchronous>, transform_indices = @transform_4, window_bounds = array<i64: 64, 32>}, {pipeline_mode = #tpu.pipeline_mode<synchronous>, transform_indices = @transform_5, window_bounds = array<i64: 64, 32>}, {pipeline_mode = #tpu.pipeline_mode<synchronous>, transform_indices = @transform_6, window_bounds = array<i64: 64, 32>}, {pipeline_mode = #tpu.pipeline_mode<synchronous>, transform_indices = @transform_7, window_bounds = array<i64: 32, 32>}, {pipeline_mode = #tpu.pipeline_mode<synchronous>, transform_indices = @transform_8, window_bounds = array<i64: 32, 32>}, {pipeline_mode = #tpu.pipeline_mode<synchronous>, transform_indices = @transform_9, window_bounds = array<i64: 32, 32>}, {pipeline_mode = #tpu.pipeline_mode<synchronous>, transform_indices = @transform_10, window_bounds = array<i64: 1, 32>}, {pipeline_mode = #tpu.pipeline_mode<synchronous>, transform_indices = @transform_11, window_bounds = array<i64: 1, 32>}, {pipeline_mode = #tpu.pipeline_mode<synchronous>, transform_indices = @transform_12, window_bounds = array<i64: 1, 32>}, {pipeline_mode = #tpu.pipeline_mode<synchronous>, transform_indices = @transform_13, window_bounds = array<i64: 1, 32>}, {pipeline_mode = #tpu.pipeline_mode<synchronous>, transform_indices = @transform_14, window_bounds = array<i64: 32, 128>}, {pipeline_mode = #tpu.pipeline_mode<synchronous>, transform_indices = @transform_15, window_bounds = array<i64: 1, 128>}, {transform_indices = @transform_16, window_bounds = array<i64: 2, 128>}]} {
    %c0 = arith.constant 0 : index
    %c0_0 = arith.constant 0 : index
    %0 = vector.load %arg1[%c0, %c0_0] : memref<2x16xf32, #tpu.memory_space<vmem>>, vector<2x16xf32>
    %c0_1 = arith.constant 0 : index
    %c0_2 = arith.constant 0 : index
    %1 = vector.load %arg2[%c0_1, %c0_2] : memref<2x32xf32, #tpu.memory_space<vmem>>, vector<2x32xf32>
    %c0_3 = arith.constant 0 : index
    %c0_4 = arith.constant 0 : index
    %2 = vector.load %arg3[%c0_3, %c0_4] : memref<16x64xf32, #tpu.memory_space<vmem>>, vector<16x64xf32>
    %cst = arith.constant dense<0.000000e+00> : vector<2x64xf32>
    %3 = tpu.matmul %0, %2, %cst {dimension_numbers = #tpu.dot_dimension_numbers<[1], [0], [0], [1], [0, 0, 1, 1], [], []>} : vector<2x16xf32>, vector<16x64xf32>, vector<2x64xf32> -> vector<2x64xf32>
    %c0_5 = arith.constant 0 : index
    %c0_6 = arith.constant 0 : index
    %4 = vector.load %arg4[%c0_5, %c0_6] : memref<1x64xf32, #tpu.memory_space<vmem>>, vector<1x64xf32>
    %5 = vector.broadcast %4 : vector<1x64xf32> to vector<2x64xf32>
    %6 = arith.addf %3, %5 : vector<2x64xf32>
    %cst_7 = arith.constant 0.000000e+00 : f32
    %7 = vector.broadcast %cst_7 : f32 to vector<2x64xf32>
    %8 = arith.maximumf %6, %7 : vector<2x64xf32>
    %c0_8 = arith.constant 0 : index
    %c0_9 = arith.constant 0 : index
    %9 = vector.load %arg5[%c0_8, %c0_9] : memref<64x32xf32, #tpu.memory_space<vmem>>, vector<64x32xf32>
    %cst_10 = arith.constant dense<0.000000e+00> : vector<2x32xf32>
    %10 = tpu.matmul %8, %9, %cst_10 {dimension_numbers = #tpu.dot_dimension_numbers<[1], [0], [0], [1], [0, 0, 1, 1], [], []>} : vector<2x64xf32>, vector<64x32xf32>, vector<2x32xf32> -> vector<2x32xf32>
    %c0_11 = arith.constant 0 : index
    %c0_12 = arith.constant 0 : index
    %11 = vector.load %arg8[%c0_11, %c0_12] : memref<32x32xf32, #tpu.memory_space<vmem>>, vector<32x32xf32>
    %cst_13 = arith.constant dense<0.000000e+00> : vector<2x32xf32>
    %12 = tpu.matmul %1, %11, %cst_13 {dimension_numbers = #tpu.dot_dimension_numbers<[1], [0], [0], [1], [0, 0, 1, 1], [], []>} : vector<2x32xf32>, vector<32x32xf32>, vector<2x32xf32> -> vector<2x32xf32>
    %13 = arith.addf %10, %12 : vector<2x32xf32>
    %c0_14 = arith.constant 0 : index
    %c0_15 = arith.constant 0 : index
    %14 = vector.load %arg11[%c0_14, %c0_15] : memref<1x32xf32, #tpu.memory_space<vmem>>, vector<1x32xf32>
    %15 = vector.broadcast %14 : vector<1x32xf32> to vector<2x32xf32>
    %16 = arith.addf %13, %15 : vector<2x32xf32>
    %cst_16 = arith.constant 5.000000e-01 : f32
    %17 = vector.broadcast %cst_16 : f32 to vector<2x32xf32>
    %18 = arith.mulf %17, %16 : vector<2x32xf32>
    %19 = math.tanh %18 : vector<2x32xf32>
    %cst_17 = arith.constant 1.000000e+00 : f32
    %20 = vector.broadcast %cst_17 : f32 to vector<2x32xf32>
    %21 = arith.addf %19, %20 : vector<2x32xf32>
    %cst_18 = arith.constant 5.000000e-01 : f32
    %22 = vector.broadcast %cst_18 : f32 to vector<2x32xf32>
    %23 = arith.mulf %22, %21 : vector<2x32xf32>
    %c0_19 = arith.constant 0 : index
    %c0_20 = arith.constant 0 : index
    %24 = vector.load %arg6[%c0_19, %c0_20] : memref<64x32xf32, #tpu.memory_space<vmem>>, vector<64x32xf32>
    %cst_21 = arith.constant dense<0.000000e+00> : vector<2x32xf32>
    %25 = tpu.matmul %8, %24, %cst_21 {dimension_numbers = #tpu.dot_dimension_numbers<[1], [0], [0], [1], [0, 0, 1, 1], [], []>} : vector<2x64xf32>, vector<64x32xf32>, vector<2x32xf32> -> vector<2x32xf32>
    %c0_22 = arith.constant 0 : index
    %c0_23 = arith.constant 0 : index
    %26 = vector.load %arg9[%c0_22, %c0_23] : memref<32x32xf32, #tpu.memory_space<vmem>>, vector<32x32xf32>
    %cst_24 = arith.constant dense<0.000000e+00> : vector<2x32xf32>
    %27 = tpu.matmul %1, %26, %cst_24 {dimension_numbers = #tpu.dot_dimension_numbers<[1], [0], [0], [1], [0, 0, 1, 1], [], []>} : vector<2x32xf32>, vector<32x32xf32>, vector<2x32xf32> -> vector<2x32xf32>
    %28 = arith.addf %25, %27 : vector<2x32xf32>
    %c0_25 = arith.constant 0 : index
    %c0_26 = arith.constant 0 : index
    %29 = vector.load %arg12[%c0_25, %c0_26] : memref<1x32xf32, #tpu.memory_space<vmem>>, vector<1x32xf32>
    %30 = vector.broadcast %29 : vector<1x32xf32> to vector<2x32xf32>
    %31 = arith.addf %28, %30 : vector<2x32xf32>
    %cst_27 = arith.constant 5.000000e-01 : f32
    %32 = vector.broadcast %cst_27 : f32 to vector<2x32xf32>
    %33 = arith.mulf %32, %31 : vector<2x32xf32>
    %34 = math.tanh %33 : vector<2x32xf32>
    %cst_28 = arith.constant 1.000000e+00 : f32
    %35 = vector.broadcast %cst_28 : f32 to vector<2x32xf32>
    %36 = arith.addf %34, %35 : vector<2x32xf32>
    %cst_29 = arith.constant 5.000000e-01 : f32
    %37 = vector.broadcast %cst_29 : f32 to vector<2x32xf32>
    %38 = arith.mulf %37, %36 : vector<2x32xf32>
    %c0_30 = arith.constant 0 : index
    %c0_31 = arith.constant 0 : index
    %39 = vector.load %arg7[%c0_30, %c0_31] : memref<64x32xf32, #tpu.memory_space<vmem>>, vector<64x32xf32>
    %cst_32 = arith.constant dense<0.000000e+00> : vector<2x32xf32>
    %40 = tpu.matmul %8, %39, %cst_32 {dimension_numbers = #tpu.dot_dimension_numbers<[1], [0], [0], [1], [0, 0, 1, 1], [], []>} : vector<2x64xf32>, vector<64x32xf32>, vector<2x32xf32> -> vector<2x32xf32>
    %c0_33 = arith.constant 0 : index
    %c0_34 = arith.constant 0 : index
    %41 = vector.load %arg13[%c0_33, %c0_34] : memref<1x32xf32, #tpu.memory_space<vmem>>, vector<1x32xf32>
    %42 = vector.broadcast %41 : vector<1x32xf32> to vector<2x32xf32>
    %43 = arith.addf %40, %42 : vector<2x32xf32>
    %c0_35 = arith.constant 0 : index
    %c0_36 = arith.constant 0 : index
    %44 = vector.load %arg10[%c0_35, %c0_36] : memref<32x32xf32, #tpu.memory_space<vmem>>, vector<32x32xf32>
    %cst_37 = arith.constant dense<0.000000e+00> : vector<2x32xf32>
    %45 = tpu.matmul %1, %44, %cst_37 {dimension_numbers = #tpu.dot_dimension_numbers<[1], [0], [0], [1], [0, 0, 1, 1], [], []>} : vector<2x32xf32>, vector<32x32xf32>, vector<2x32xf32> -> vector<2x32xf32>
    %c0_38 = arith.constant 0 : index
    %c0_39 = arith.constant 0 : index
    %46 = vector.load %arg14[%c0_38, %c0_39] : memref<1x32xf32, #tpu.memory_space<vmem>>, vector<1x32xf32>
    %47 = vector.broadcast %46 : vector<1x32xf32> to vector<2x32xf32>
    %48 = arith.addf %45, %47 : vector<2x32xf32>
    %49 = arith.mulf %23, %48 : vector<2x32xf32>
    %50 = arith.addf %43, %49 : vector<2x32xf32>
    %51 = math.tanh %50 : vector<2x32xf32>
    %cst_40 = arith.constant 1.000000e+00 : f32
    %52 = vector.broadcast %cst_40 : f32 to vector<2x32xf32>
    %53 = arith.subf %52, %38 : vector<2x32xf32>
    %54 = arith.mulf %53, %51 : vector<2x32xf32>
    %55 = arith.mulf %38, %1 : vector<2x32xf32>
    %56 = arith.addf %54, %55 : vector<2x32xf32>
    %c0_41 = arith.constant 0 : index
    %c0_42 = arith.constant 0 : index
    %57 = vector.load %arg15[%c0_41, %c0_42] : memref<32x128xf32, #tpu.memory_space<vmem>>, vector<32x128xf32>
    %cst_43 = arith.constant dense<0.000000e+00> : vector<2x128xf32>
    %58 = tpu.matmul %56, %57, %cst_43 {dimension_numbers = #tpu.dot_dimension_numbers<[1], [0], [0], [1], [0, 0, 1, 1], [], []>} : vector<2x32xf32>, vector<32x128xf32>, vector<2x128xf32> -> vector<2x128xf32>
    %c0_44 = arith.constant 0 : index
    %c0_45 = arith.constant 0 : index
    %59 = vector.load %arg16[%c0_44, %c0_45] : memref<1x128xf32, #tpu.memory_space<vmem>>, vector<1x128xf32>
    %60 = vector.broadcast %59 : vector<1x128xf32> to vector<2x128xf32>
    %61 = arith.addf %58, %60 : vector<2x128xf32>
    %c0_46 = arith.constant 0 : index
    %c0_47 = arith.constant 0 : index
    %62 = vector.load %arg17[%c0_46, %c0_47] : memref<2x128xf32, #tpu.memory_space<vmem>>, vector<2x128xf32>
    tpu.vector_store %arg17[%c0_46, %c0_47], %61 {strides = array<i32>} : memref<2x128xf32, #tpu.memory_space<vmem>>, vector<2x128xf32>,
    return
  }
  func.func @transform_0(%arg0: i32) -> (i32, i32) {
    %c0_i32 = arith.constant 0 : i32
    %c0_i32_0 = arith.constant 0 : i32
    return %arg0, %c0_i32 : i32, i32
  }
  func.func @transform_1(%arg0: i32) -> (i32, i32) {
    %c0_i32 = arith.constant 0 : i32
    %c0_i32_0 = arith.constant 0 : i32
    return %arg0, %c0_i32 : i32, i32
  }
  func.func @transform_2(%arg0: i32) -> (i32, i32) {
    %c0_i32 = arith.constant 0 : i32
    %c0_i32_0 = arith.constant 0 : i32
    %c0_i32_1 = arith.constant 0 : i32
    return %c0_i32, %c0_i32_0 : i32, i32
  }
  func.func @transform_3(%arg0: i32) -> (i32, i32) {
    %c0_i32 = arith.constant 0 : i32
    %c0_i32_0 = arith.constant 0 : i32
    %c0_i32_1 = arith.constant 0 : i32
    return %c0_i32, %c0_i32_0 : i32, i32
  }
  func.func @transform_4(%arg0: i32) -> (i32, i32) {
    %c0_i32 = arith.constant 0 : i32
    %c0_i32_0 = arith.constant 0 : i32
    %c0_i32_1 = arith.constant 0 : i32
    return %c0_i32, %c0_i32_0 : i32, i32
  }
  func.func @transform_5(%arg0: i32) -> (i32, i32) {
    %c0_i32 = arith.constant 0 : i32
    %c0_i32_0 = arith.constant 0 : i32
    %c0_i32_1 = arith.constant 0 : i32
    return %c0_i32, %c0_i32_0 : i32, i32
  }
  func.func @transform_6(%arg0: i32) -> (i32, i32) {
    %c0_i32 = arith.constant 0 : i32
    %c0_i32_0 = arith.constant 0 : i32
    %c0_i32_1 = arith.constant 0 : i32
    return %c0_i32, %c0_i32_0 : i32, i32
  }
  func.func @transform_7(%arg0: i32) -> (i32, i32) {
    %c0_i32 = arith.constant 0 : i32
    %c0_i32_0 = arith.constant 0 : i32
    %c0_i32_1 = arith.constant 0 : i32
    return %c0_i32, %c0_i32_0 : i32, i32
  }
  func.func @transform_8(%arg0: i32) -> (i32, i32) {
    %c0_i32 = arith.constant 0 : i32
    %c0_i32_0 = arith.constant 0 : i32
    %c0_i32_1 = arith.constant 0 : i32
    return %c0_i32, %c0_i32_0 : i32, i32
  }
  func.func @transform_9(%arg0: i32) -> (i32, i32) {
    %c0_i32 = arith.constant 0 : i32
    %c0_i32_0 = arith.constant 0 : i32
    %c0_i32_1 = arith.constant 0 : i32
    return %c0_i32, %c0_i32_0 : i32, i32
  }
  func.func @transform_10(%arg0: i32) -> (i32, i32) {
    %c0_i32 = arith.constant 0 : i32
    %c0_i32_0 = arith.constant 0 : i32
    %c0_i32_1 = arith.constant 0 : i32
    return %c0_i32, %c0_i32_0 : i32, i32
  }
  func.func @transform_11(%arg0: i32) -> (i32, i32) {
    %c0_i32 = arith.constant 0 : i32
    %c0_i32_0 = arith.constant 0 : i32
    %c0_i32_1 = arith.constant 0 : i32
    return %c0_i32, %c0_i32_0 : i32, i32
  }
  func.func @transform_12(%arg0: i32) -> (i32, i32) {
    %c0_i32 = arith.constant 0 : i32
    %c0_i32_0 = arith.constant 0 : i32
    %c0_i32_1 = arith.constant 0 : i32
    return %c0_i32, %c0_i32_0 : i32, i32
  }
  func.func @transform_13(%arg0: i32) -> (i32, i32) {
    %c0_i32 = arith.constant 0 : i32
    %c0_i32_0 = arith.constant 0 : i32
    %c0_i32_1 = arith.constant 0 : i32
    return %c0_i32, %c0_i32_0 : i32, i32
  }
  func.func @transform_14(%arg0: i32) -> (i32, i32) {
    %c0_i32 = arith.constant 0 : i32
    %c0_i32_0 = arith.constant 0 : i32
    %c0_i32_1 = arith.constant 0 : i32
    return %c0_i32, %c0_i32_0 : i32, i32
  }
  func.func @transform_15(%arg0: i32) -> (i32, i32) {
    %c0_i32 = arith.constant 0 : i32
    %c0_i32_0 = arith.constant 0 : i32
    %c0_i32_1 = arith.constant 0 : i32
    return %c0_i32, %c0_i32_0 : i32, i32
  }
  func.func @transform_16(%arg0: i32) -> (i32, i32) {
    %c0_i32 = arith.constant 0 : i32
    %c0_i32_0 = arith.constant 0 : i32
    return %arg0, %c0_i32 : i32, i32
  }
}

</mosaic_0001>

<bundles_post_ra>
// kernel: tpu_custom_call.1
= control target key start
LH: loop header
LB: loop body
LE: loop exit
PB: predicated region body
PF: predicated region fallthrough
CT: control target
= control target key end

     0   :  { %s1318_s0 = inlined_call_operand.vmem [shape: f32[2,16], index: 0, kind: input, shape index: {}]   ;;  %s1319_s1 = inlined_call_operand.vmem [shape: f32[2,32], index: 1, kind: input, shape index: {}]   ;;  %s1320_s2 = inlined_call_operand.vmem [shape: f32[16,64], index: 2, kind: input, shape index: {}]   ;;  %s1321_s3 = inlined_call_operand.vmem [shape: f32[1,64], index: 3, kind: input, shape index: {}]   ;;  %s1322_s4 = inlined_call_operand.vmem [shape: f32[64,32], index: 4, kind: input, shape index: {}]   ;;  %s1323_s5 = inlined_call_operand.vmem [shape: f32[64,32], index: 5, kind: input, shape index: {}]   ;;  %s1324_s6 = inlined_call_operand.vmem [shape: f32[64,32], index: 6, kind: input, shape index: {}]   ;;  %s1325_s7 = inlined_call_operand.vmem [shape: f32[32,32], index: 7, kind: input, shape index: {}]   ;;  %s1326_s8 = inlined_call_operand.vmem [shape: f32[32,32], index: 8, kind: input, shape index: {}]   ;;  %s1327_s9 = inlined_call_operand.vmem [shape: f32[32,32], index: 9, kind: input, shape index: {}]   ;;  %s1328_s10 = inlined_call_operand.vmem [shape: f32[1,32], index: 10, kind: input, shape index: {}]   ;;  %s1329_s11 = inlined_call_operand.vmem [shape: f32[1,32], index: 11, kind: input, shape index: {}]   ;;  %s1330_s12 = inlined_call_operand.vmem [shape: f32[1,32], index: 12, kind: input, shape index: {}]   ;;  %s1331_s13 = inlined_call_operand.vmem [shape: f32[1,32], index: 13, kind: input, shape index: {}]   ;;  %s1332_s14 = inlined_call_operand.vmem [shape: f32[32,128], index: 14, kind: input, shape index: {}]   ;;  %s1333_s15 = inlined_call_operand.vmem [shape: f32[1,128], index: 15, kind: input, shape index: {}]   ;;  %s1334_s16 = inlined_call_operand.hbm [shape: f32[2,128], index: 16, kind: output, shape index: {}]  }
   0x1   :  { %1335 = sst [smem:[#allocation5_spill]] %s1318_s0 }
   0x2   :  { %v56_v0 = vld [vmem:[%s1320_s2] sm:$0xff]  ;;  %v57_v1 = vld [vmem:[%s1320_s2 + $0x8] sm:$0xff]  ;;  %v1017_v2 = vmov 0.0|0.0   ;;  %vm1018_vm0 = vmmov 0   ;;  %v1019_v4 = vmov 0.0   ;;  %v150_v8 = vld [vmem:[%s1325_s7 + $0x10] sm:$0xff] }
   0x3   :  { %920 = vmatprep.subr.bf16.mxu0 %v1017_v2  ;;  %v921_v3 = vpack.c.bf16 %v57_v1, %v56_v0  ;;  %816 = vmatprep.mubr.msk.f32.mxu0 %vm1018_vm0, %v1019_v4  ;;  %v148_v5 = vld [vmem:[%s1325_s7] sm:$0xff]  ;;  %v149_v6 = vld [vmem:[%s1325_s7 + $0x8] sm:$0xff]  ;;  %v151_v9 = vld [vmem:[%s1325_s7 + $0x18] sm:$0xff]  ;;  %s1336_s19 = sld [smem:[#allocation5_spill]]  ;;  %vm65_vm1 = vcmask 130048   ;;  %vm152_vm2 = vcmask 261120  }
   0x4   :  { %923 = vmatprep.subr.bf16.mxu1 %v1017_v2  ;;  %v924_v7 = vpack.c.bf16 %v149_v6, %v148_v5  ;;  %827 = vmatprep.mubr.msk.f32.mxu1 %vm1018_vm0, %v1019_v4  ;;  %v927_v11 = vpack.c.bf16 %v151_v9, %v150_v8  ;;  %v140_v12 = vld [vmem:[%s1322_s4] sm:$0xff]  ;;  %v141_v13 = vld [vmem:[%s1322_s4 + $0x8] sm:$0xff]  ;;  %v142_v17 = vld [vmem:[%s1322_s4 + $0x10] sm:$0xff] }
   0x5   :  { %922 = vmatpush3.bf16.msra.mxu0 %v921_v3  ;;  %v320_v14 = vld [vmem:[%s1326_s8] sm:$0xff]  ;;  %v321_v15 = vld [vmem:[%s1326_s8 + $0x8] sm:$0xff]  ;;  %v930_v16 = vpack.c.bf16 %v141_v13, %v140_v12  ;;  %v143_v18 = vld [vmem:[%s1322_s4 + $0x18] sm:$0xff] }
   0x6   :  { %925 = vmatpush3.bf16.msra.mxu1 %v924_v7  ;;  %929 = vmatprep.subr.bf16.mxu0 %v1017_v2  ;;  %v1156_v19 = vld [vmem:[%s1319_s1] sm:$0x3]  ;;  %v933_v20 = vpack.c.bf16 %v143_v18, %v142_v17  ;;  %v942_v21 = vpack.c.bf16 %v321_v15, %v320_v14  ;;  %v145_v23 = vld [vmem:[%s1322_s4 + $0x28] sm:$0xff] }
   0x7   :  { %926 = vmatprep.subr.bf16.mxu1 %v1017_v2  ;;  %v144_v22 = vld [vmem:[%s1322_s4 + $0x20] sm:$0xff] }
   0x9   :  { %v54_v10 = vld [vmem:[%s1336_s19] sm:$0x3] }
   0xa   :  { %817 = vmatmul.mubr.msk.f32.vlgmr.msra.gmra.mrb[0].mxu0 %vm65_vm1, %v54_v10  ;;  %928 = vmatpush3.bf16.msra.mxu1 %v927_v11 }
   0xb   :  { %931 = vmatpush3.bf16.msra.mxu0 %v930_v16  ;;  %846 = vmatprep.mubr.msk.f32.mxu0 %vm1018_vm0, %v1019_v4 }
   0xc   :  { %932 = vmatprep.subr.bf16.mxu0 %v1017_v2 }
   0xd   :  { %21 = vsyncpa [#allocation3], 0  ;;  %941 = vmatprep.subr.bf16.mxu1 %v1017_v2  ;;  %v322_v24 = vld [vmem:[%s1326_s8 + $0x10] sm:$0xff]  ;;  %v323_v25 = vld [vmem:[%s1326_s8 + $0x18] sm:$0xff]  ;;  %828 = vmatmul.mubr.msk.f32.vlgmr.msra.gmra.mrb[0].mxu1 %vm152_vm2, %v1156_v19  ;;  %v936_v26 = vpack.c.bf16 %v145_v23, %v144_v22  ;;  %vm226_vm3 = vcmask 523264  }
   0xe   :  { %943 = vmatpush3.bf16.msra.mxu1 %v942_v21  ;;  %v945_v27 = vpack.c.bf16 %v323_v25, %v322_v24  ;;  %857 = vmatprep.mubr.msk.f32.mxu1 %vm1018_vm0, %v1019_v4  ;;  %v312_v28 = vld [vmem:[%s1323_s5] sm:$0xff]  ;;  %v313_v29 = vld [vmem:[%s1323_s5 + $0x8] sm:$0xff]  ;;  %v314_v31 = vld [vmem:[%s1323_s5 + $0x10] sm:$0xff] }
   0xf   :  { %934 = vmatpush3.bf16.msra.mxu0 %v933_v20  ;;  %944 = vmatprep.subr.bf16.mxu1 %v1017_v2  ;;  %v948_v30 = vpack.c.bf16 %v313_v29, %v312_v28  ;;  %v315_v32 = vld [vmem:[%s1323_s5 + $0x18] sm:$0xff]  ;;  %v316_v34 = vld [vmem:[%s1323_s5 + $0x20] sm:$0xff]  ;;  %v317_v35 = vld [vmem:[%s1323_s5 + $0x28] sm:$0xff] }
  0x10   :  { %935 = vmatprep.subr.bf16.mxu0 %v1017_v2  ;;  %v951_v33 = vpack.c.bf16 %v315_v32, %v314_v31  ;;  %v954_v36 = vpack.c.bf16 %v317_v35, %v316_v34  ;;  %v146_v37 = vld [vmem:[%s1322_s4 + $0x30] sm:$0xff]  ;;  %v147_v38 = vld [vmem:[%s1322_s4 + $0x38] sm:$0xff]  ;;  %v748_v43 = vld [vmem:[%s1321_s3] ss:$0 sm:$0xff] }
  0x11   :  { %v939_v39 = vpack.c.bf16 %v147_v38, %v146_v37  ;;  %v318_v40 = vld [vmem:[%s1323_s5 + $0x30] sm:$0xff]  ;;  %v319_v41 = vld [vmem:[%s1323_s5 + $0x38] sm:$0xff]  ;;  %v476_v44 = vld [vmem:[%s1324_s6] sm:$0xff] }
  0x12   :  { %946 = vmatpush3.bf16.msra.mxu1 %v945_v27  ;;  %v957_v42 = vpack.c.bf16 %v319_v41, %v318_v40  ;;  %v477_v45 = vld [vmem:[%s1324_s6 + $0x8] sm:$0xff]  ;;  %v561_v46 = vld [vmem:[%s1327_s9] sm:$0xff]  ;;  %v478_v52 = vld [vmem:[%s1324_s6 + $0x10] sm:$0xff] }
  0x13   :  { %937 = vmatpush3.bf16.msra.mxu0 %v936_v26  ;;  %947 = vmatprep.subr.bf16.mxu1 %v1017_v2  ;;  %v562_v47 = vld [vmem:[%s1327_s9 + $0x8] sm:$0xff]  ;;  %v960_v51 = vpack.c.bf16 %v477_v45, %v476_v44  ;;  %v479_v55 = vld [vmem:[%s1324_s6 + $0x18] sm:$0xff]  ;;  %v563_v56 = vld [vmem:[%s1327_s9 + $0x10] sm:$0xff] }
  0x14   :  { %938 = vmatprep.subr.bf16.mxu0 %v1017_v2  ;;  %v972_v53 = vpack.c.bf16 %v562_v47, %v561_v46  ;;  %v564_v57 = vld [vmem:[%s1327_s9 + $0x18] sm:$0xff]  ;;  %v963_v59 = vpack.c.bf16 %v479_v55, %v478_v52  ;;  %v480_v62 = vld [vmem:[%s1324_s6 + $0x20] sm:$0xff]  ;;  %v481_v63 = vld [vmem:[%s1324_s6 + $0x28] sm:$0xff] }
  0x15   :  { %858 = vmatmul.mubr.msk.f32.vlgmr.msra.gmra.mrb[2].mxu1 %vm152_vm2, %v1156_v19  ;;  %v975_v60 = vpack.c.bf16 %v564_v57, %v563_v56  ;;  %v966_v0 = vpack.c.bf16 %v481_v63, %v480_v62  ;;  %v482_v1 = vld [vmem:[%s1324_s6 + $0x30] sm:$0xff]  ;;  %v483_v3 = vld [vmem:[%s1324_s6 + $0x38] sm:$0xff]  ;;  %v649_v8 = vld [vmem:[%s1332_s14] sm:$0xff] }
  0x16   :  { %949 = vmatpush3.bf16.msra.mxu1 %v948_v30  ;;  %876 = vmatprep.mubr.msk.f32.mxu1 %vm1018_vm0, %v1019_v4  ;;  %v969_v6 = vpack.c.bf16 %v483_v3, %v482_v1  ;;  %v650_v9 = vld [vmem:[%s1332_s14 + $0x8] sm:$0xff]  ;;  %v651_v10 = vld [vmem:[%s1332_s14 + $0x10] sm:$0xff]  ;;  %v652_v12 = vld [vmem:[%s1332_s14 + $0x18] sm:$0xff] }
  0x17   :  { %950 = vmatprep.subr.bf16.mxu1 %v1017_v2  ;;  %940 = vmatpush3.bf16.msra.mxu0 %v939_v39  ;;  %v978_v11 = vpack.c.bf16 %v650_v9, %v649_v8  ;;  %v981_v13 = vpack.c.bf16 %v652_v12, %v651_v10  ;;  %v752_v14 = vld [vmem:[%s1328_s10] ss:$0 sm:$0xff] }
  0x18   :  { %959 = vmatprep.subr.bf16.mxu0 %v1017_v2  ;;  %v755_v22 = vld [vmem:[%s1329_s11] ss:$0 sm:$0xff] }
  0x19   :  { %v758_v27 = vld [vmem:[%s1331_s13] ss:$0 sm:$0xff] }
  0x1a   :  { %952 = vmatpush3.bf16.msra.mxu1 %v951_v33  ;;  %v756_v33 = vld [vmem:[%s1330_s12] ss:$0 sm:$0xff]  ;;  %s1020_s12 = smov [#allocation2]  }
  0x1b   :  { %953 = vmatprep.subr.bf16.mxu1 %v1017_v2  ;;  %v760_v46 = vld [vmem:[%s1333_s15] ss:$0 sm:$0xff]  ;;  %s740_s20 = sshll.u32 %s1020_s12, 4  ;;  %s741_s20 = int_to_ptr.vmem [resolvable:$true] %s740_s20 }
  0x1c   :  { %s993_s1 = scalar_lea.vmem %s741_s20, 32  ;;  %p998_p1 = scmp.lt.s32.totalorder %s741_s20, %s741_s20 }
  0x1d   :  { %p994_p0 = scmp.ne.s32.totalorder %s741_s20, %s993_s1  ;;  %p999_p2 = scmp.lt.s32.totalorder %s993_s1, %s993_s1 }
  0x1e   :  { %955 = vmatpush3.bf16.msra.mxu1 %v954_v36 }
  0x1f   :  { %956 = vmatprep.subr.bf16.mxu1 %v1017_v2  ;;  %p1000_p3 = por %p999_p2, %p998_p1 }
  0x21   :  { %p1001_p4 = pnand %p1000_p3, %p994_p0 }
  0x22   :  { %958 = vmatpush3.bf16.msra.mxu1 %v957_v42 }
  0x23   :  { %971 = vmatprep.subr.bf16.mxu1 %v1017_v2 }
  0xdd   :  { %v135_v48 = vpop.f32.mrb[0].mxu0 }
  0xde   :  { %v136_v49 = vadd.f32 %v748_v43, %v135_v48  ;;  %v818_v50 = vpop.f32.mrb[1].mxu0 }
  0xe0   :  { %v139_v54 = vmax.f32 %v136_v49, 0.0  ;;  %v222_v58 = vpop.f32.mrb[0].mxu1 }
  0xe1   :  { %v829_v61 = vpop.f32.mrb[1].mxu1 }
  0xe2   :  { %847 = vmatmul.mubr.msk.f32.vlgmr.msra.gmra.mrb[2].mxu0 %vm226_vm3, %v139_v54  ;;  %877 = vmatmul.mubr.msk.f32.vlgmr.msra.gmra.mrb[4].mxu1 %vm226_vm3, %v139_v54 }
  0xe3   :  { %961 = vmatpush3.bf16.msra.mxu0 %v960_v51  ;;  %973 = vmatpush3.bf16.msra.mxu1 %v972_v53 }
  0xe4   :  { %962 = vmatprep.subr.bf16.mxu0 %v1017_v2  ;;  %895 = vmatprep.mubr.msk.f32.mxu0 %vm1018_vm0, %v1019_v4 }
  0xe5   :  { %974 = vmatprep.subr.bf16.mxu1 %v1017_v2  ;;  %906 = vmatprep.mubr.msk.f32.mxu1 %vm1018_vm0, %v1019_v4 }
  0xe7   :  { %964 = vmatpush3.bf16.msra.mxu0 %v963_v59  ;;  %976 = vmatpush3.bf16.msra.mxu1 %v975_v60 }
  0xe8   :  { %965 = vmatprep.subr.bf16.mxu0 %v1017_v2  ;;  %v390_v5 = vpop.f32.mrb[2].mxu1 }
  0xe9   :  { %v859_v7 = vpop.f32.mrb[3].mxu1 }
  0xea   :  { %907 = vmatmul.mubr.msk.f32.vlgmr.msra.gmra.mrb[6].mxu1 %vm152_vm2, %v1156_v19 }
  0xeb   :  { %967 = vmatpush3.bf16.msra.mxu0 %v966_v0 }
  0xec   :  { %968 = vmatprep.subr.bf16.mxu0 %v1017_v2 }
  0xef   :  { %970 = vmatpush3.bf16.msra.mxu0 %v969_v6 }
  0xf0   :  { %977 = vmatprep.subr.bf16.mxu0 %v1017_v2 }
  0xf2   :  { %896 = vmatmul.mubr.msk.f32.vlgmr.msra.gmra.mrb[4].mxu0 %vm226_vm3, %v139_v54 }
  0xf3   :  { %917 = vmatprep.mubr.msk.f32.mxu0 %vm1018_vm0, %v1019_v4  ;;  %979 = vmatpush3.bf16.msra.mxu0 %v978_v11 }
  0xf4   :  { %980 = vmatprep.subr.bf16.mxu0 %v1017_v2 }
  0xf7   :  { %982 = vmatpush3.bf16.msra.mxu0 %v981_v13 }
 0x1b5   :  { %v296_v4 = vpop.f32.mrb[2].mxu0  ;;  %v460_v15 = vpop.f32.mrb[4].mxu1 }
 0x1b6   :  { %v297_v16 = vadd.f32 %v296_v4, %v222_v58  ;;  %v461_v17 = vadd.f32 %v460_v15, %v390_v5  ;;  %v848_v18 = vpop.f32.mrb[3].mxu0  ;;  %v878_v20 = vpop.f32.mrb[5].mxu1 }
 0x1b8   :  { %v307_v21 = vadd.f32 %v752_v14, %v297_v16  ;;  %v471_v24 = vadd.f32 %v755_v22, %v461_v17 }
 0x1ba   :  { %v308_v23 = vmul.f32 0.5, %v307_v21  ;;  %v472_v26 = vmul.f32 0.5, %v471_v24 }
 0x1bc   :  { %987 = vtanh.f32 %v308_v23 }
 0x1bd   :  { %v638_v2 = vpop.f32.mrb[6].mxu1  ;;  %989 = vtanh.f32 %v472_v26 }
 0x1be   :  { %v908_v25 = vpop.f32.mrb[7].mxu1  ;;  %v639_v32 = vadd.f32 %v758_v27, %v638_v2 }
 0x1c5   :  { %v557_v28 = vpop.f32.mrb[4].mxu0 }
 0x1c6   :  { %v988_v29 = vpop.eup %987  ;;  %v897_v30 = vpop.f32.mrb[5].mxu0  ;;  %v558_v35 = vadd.f32 %v756_v33, %v557_v28 }
 0x1c7   :  { %v310_v31 = vadd.f32 1.0, %v988_v29  ;;  %v990_v37 = vpop.eup %989 }
 0x1c8   :  { %v474_v39 = vadd.f32 1.0, %v990_v37 }
 0x1c9   :  { %v311_v34 = vmul.f32 0.5, %v310_v31 }
 0x1ca   :  { %v475_v40 = vmul.f32 0.5, %v474_v39 }
 0x1cb   :  { %v642_v36 = vmul.f32 %v639_v32, %v311_v34 }
 0x1cc   :  { %v645_v41 = vsub.f32 1.0, %v475_v40  ;;  %v647_v43 = vmul.f32 %v475_v40, %v1156_v19 }
 0x1cd   :  { %v643_v38 = vadd.f32 %v642_v36, %v558_v35 }
 0x1cf   :  { %991 = vtanh.f32 %v643_v38 }
 0x1d9   :  { %v992_v42 = vpop.eup %991 }
 0x1da   :  { %v646_v44 = vmul.f32 %v992_v42, %v645_v41 }
 0x1dc   :  { %v648_v45 = vadd.f32 %v647_v43, %v646_v44 }
 0x1de   :  { %918 = vmatmul.mubr.msk.f32.vlgmr.msra.gmra.mrb[6].mxu0 %vm152_vm2, %v648_v45 }
 0x2b1   :  { %v729_v47 = vpop.f32.mrb[6].mxu0 }
 0x2b2   :  { %v730_v48 = vadd.f32 %v760_v46, %v729_v47  ;;  %v919_v49 = vpop.f32.mrb[7].mxu0 }
 0x2b4   :  { %733 = vst [vmem:[#allocation2] sm:$0x3] %v730_v48 }
 0x2b5   :  { %1004 = shalt.err (!%p1001_p4)
}
 0x2b6   :  { %s1005_s23 = scalar_lea.hbm %s1334_s16, 32 }
 0x2b7   :  { %p1006_p5 = scmp.ne.s32.totalorder %s1334_s16, %s1005_s23  ;;  %p1009_p6 = scmp.lt.u32.totalorder %s1005_s23, %s1334_s16 }
 0x2b9   :  { %p1011_p7 = pnand %p1009_p6, %p1006_p5 }
 0x2bb   :  { %1014 = shalt.err (!%p1011_p7)
}
 0x2bc   :  { %743 = dma.vmem_to_hbm [thread:$0]  %s741_s20, 32, %s1334_s16, [#allocation3]  }
 0x2bd   :  { %1015 = dma.done.wait [#allocation3], 32  }
 0x2be   :  { %1016 = vsyncadd [#allocation3], 4294967264 }
 0x2bf   :  { %747 = vsyncpa [#allocation3], 1 }

</bundles_post_ra>
